<compile_context>
chip_gen: v6e
topology: v6e:2x2x1
jax: 0.10.0
libtpu: 0.0.40
codegen_flags: <defaults>
</compile_context>

<pallas_src>
import functools

import jax
import jax.numpy as jnp
from jax import lax
from jax.experimental import pallas as pl
from jax.experimental.pallas import tpu as pltpu

LANE = 128   # vreg lane width
CHUNK = 64   # sublane rows per inner compute chunk (8 vregs / channel plane)


def _conv1x1_kernel(w_ref, b_ref, x_ref, o_ref, *, cin, cout, chunk, n_chunks):
    # w_ref: SMEM (Cout, Cin) f32 scalars
    # b_ref: SMEM (Cout,)     f32 scalars
    # x_ref: VMEM (Cin,  rt, 128)  dense channel planes for one batch element
    # o_ref: VMEM (Cout, rt, 128)
    w = [[w_ref[co, ci] for ci in range(cin)] for co in range(cout)]
    b = [b_ref[co] for co in range(cout)]

    def compute(r0, size):
        # 9 broadcast-FMAs on dense (size, 128) planes.  Channel planes are
        # re-read from the VMEM ref per output channel (cheap vld) instead of
        # holding the whole tile live in vregs; each output channel is written
        # directly (no concat -> unmasked vst).
        for co in range(cout):
            acc = x_ref[0, pl.ds(r0, size), :] * w[co][0]
            for ci in range(1, cin):
                acc = acc + x_ref[ci, pl.ds(r0, size), :] * w[co][ci]
            o_ref[co, pl.ds(r0, size), :] = (acc + b[co]).astype(o_ref.dtype)

    if n_chunks == 1:
        compute(0, x_ref.shape[1])
    else:
        def body(c, carry):
            compute(pl.multiple_of(c * chunk, chunk), chunk)
            return carry
        lax.fori_loop(0, n_chunks, body, 0, unroll=False)


def conv1x1_pallas(x_nchw, weight, bias, *, rows_per_tile=1024):
    """x_nchw: (N, Cin, H, W); weight: (Cout, Cin, 1, 1); bias: (Cout,)."""
    N, Cin, H, W = x_nchw.shape
    Cout = weight.shape[0]
    S = H * W
    itemsize = jnp.dtype(x_nchw.dtype).itemsize

    # Spatial axis as dense (rows, 128) planes per channel.
    R = pl.cdiv(S, LANE)
    S_pad = R * LANE
    x = x_nchw.reshape(N, Cin, S)
    if S_pad != S:
        # TODO(synk): an in-kernel masked tail store would avoid this copy.
        x = jnp.pad(x, ((0, 0), (0, 0), (0, S_pad - S)))
    x = x.reshape(N, Cin, R, LANE)

    # Rows-per-tile: full extent if small (allowed even if not a multiple of 8
    # since it equals the array dim), else a multiple of CHUNK, shrunk until
    # the grid keeps a handful of steps (v7x megacore + pipeline overlap).
    if R <= CHUNK:
        rt, chunk, n_chunks = R, R, 1
    else:
        rt = max(CHUNK, (min(rows_per_tile, R) // CHUNK) * CHUNK)
        while rt > CHUNK and N * pl.cdiv(R, rt) < 4:
            rt = max(CHUNK, ((rt // 2) // CHUNK) * CHUNK)
        chunk = CHUNK
        n_chunks = rt // CHUNK

    grid = (N, pl.cdiv(R, rt))

    w_mat = weight.reshape(Cout, Cin).astype(jnp.float32)   # 9 scalars -> SMEM
    b_vec = bias.astype(jnp.float32)                        # 3 scalars -> SMEM

    cost = pl.CostEstimate(
        flops=2 * N * S_pad * Cin * Cout,
        transcendentals=0,
        bytes_accessed=itemsize * N * S_pad * (Cin + Cout),
    )

    kernel = functools.partial(
        _conv1x1_kernel, cin=Cin, cout=Cout, chunk=chunk, n_chunks=n_chunks)

    out = pl.pallas_call(
        kernel,
        out_shape=jax.ShapeDtypeStruct((N, Cout, R, LANE), x_nchw.dtype),
        grid_spec=pltpu.PrefetchScalarGridSpec(
            num_scalar_prefetch=0,
            grid=grid,
            in_specs=[
                pl.BlockSpec(memory_space=pltpu.MemorySpace.SMEM),   # weight
                pl.BlockSpec(memory_space=pltpu.MemorySpace.SMEM),   # bias
                pl.BlockSpec((None, Cin, rt, LANE),
                             lambda n, s: (n, 0, s, 0)),             # x
            ],
            out_specs=pl.BlockSpec((None, Cout, rt, LANE),
                                   lambda n, s: (n, 0, s, 0)),
        ),
        compiler_params=pltpu.CompilerParams(
            dimension_semantics=("parallel", "parallel")),
        cost_estimate=cost,
    )(w_mat, b_vec, x)

    out = out.reshape(N, Cout, S_pad)
    if S_pad != S:
        out = out[:, :, :S]
    return out.reshape(N, Cout, H, W)


def conv1x1_ref(x_nchw, weight, bias):
    # Pure-JAX reference for correctness check.
    w = weight.reshape(weight.shape[0], weight.shape[1])  # (Cout, Cin)
    y = jnp.einsum("nchw,oc->nohw", x_nchw, w)
    return y + bias.reshape(1, -1, 1, 1)


if __name__ == "__main__":
    key = jax.random.PRNGKey(0)
    kx, kw, kb = jax.random.split(key, 3)

    # Shapes consistent with Conv2d(3, 3, kernel_size=(1, 1)).
    N, C, H, W = 2, 3, 16, 16
    x = jax.random.normal(kx, (N, C, H, W), dtype=jnp.float32)
    weight = jax.random.normal(kw, (3, 3, 1, 1), dtype=jnp.float32) * 0.1
    bias = jax.random.normal(kb, (3,), dtype=jnp.float32) * 0.1

    out = conv1x1_pallas(x, weight, bias)
    out = jax.block_until_ready(out)

    ref = conv1x1_ref(x, weight, bias)
    assert out.shape == (N, 3, H, W), out.shape
    assert jnp.allclose(out, ref, atol=1e-5, rtol=1e-5), "mismatch vs reference"

    print("KERNEL_OK")
</pallas_src>

<mosaic_0001>
module attributes {stable_mosaic.version = 11 : i64} {
  func.func @_conv1x1_kernel(%arg0: i32, %arg1: i32, %arg2: memref<3x3xf32, #tpu.memory_space<smem>>, %arg3: memref<3xf32, #tpu.memory_space<smem>>, %arg4: memref<1x3x2x128xf32, #tpu.memory_space<vmem>>, %arg5: memref<1x3x2x128xf32, #tpu.memory_space<vmem>>) attributes {dimension_semantics = [#tpu.dimension_semantics<parallel>, #tpu.dimension_semantics<parallel>], iteration_bounds = array<i64: 2, 1>, scalar_prefetch = 0 : i64, scratch_operands = 0 : i64, tpu.core_type = #tpu.core_type<tc>, window_params = [{transform_indices = @transform_0, window_bounds = array<i64: 3, 3>}, {transform_indices = @transform_1, window_bounds = array<i64: 3>}, {transform_indices = @transform_2, window_bounds = array<i64: 1, 3, 2, 128>}, {transform_indices = @transform_3, window_bounds = array<i64: 1, 3, 2, 128>}]} {
    %c0 = arith.constant 0 : index
    %c0_0 = arith.constant 0 : index
    %0 = memref.load %arg2[%c0, %c0_0] : memref<3x3xf32, #tpu.memory_space<smem>>
    %c0_1 = arith.constant 0 : index
    %c1 = arith.constant 1 : index
    %1 = memref.load %arg2[%c0_1, %c1] : memref<3x3xf32, #tpu.memory_space<smem>>
    %c0_2 = arith.constant 0 : index
    %c2 = arith.constant 2 : index
    %2 = memref.load %arg2[%c0_2, %c2] : memref<3x3xf32, #tpu.memory_space<smem>>
    %c1_3 = arith.constant 1 : index
    %c0_4 = arith.constant 0 : index
    %3 = memref.load %arg2[%c1_3, %c0_4] : memref<3x3xf32, #tpu.memory_space<smem>>
    %c1_5 = arith.constant 1 : index
    %c1_6 = arith.constant 1 : index
    %4 = memref.load %arg2[%c1_5, %c1_6] : memref<3x3xf32, #tpu.memory_space<smem>>
    %c1_7 = arith.constant 1 : index
    %c2_8 = arith.constant 2 : index
    %5 = memref.load %arg2[%c1_7, %c2_8] : memref<3x3xf32, #tpu.memory_space<smem>>
    %c2_9 = arith.constant 2 : index
    %c0_10 = arith.constant 0 : index
    %6 = memref.load %arg2[%c2_9, %c0_10] : memref<3x3xf32, #tpu.memory_space<smem>>
    %c2_11 = arith.constant 2 : index
    %c1_12 = arith.constant 1 : index
    %7 = memref.load %arg2[%c2_11, %c1_12] : memref<3x3xf32, #tpu.memory_space<smem>>
    %c2_13 = arith.constant 2 : index
    %c2_14 = arith.constant 2 : index
    %8 = memref.load %arg2[%c2_13, %c2_14] : memref<3x3xf32, #tpu.memory_space<smem>>
    %c0_15 = arith.constant 0 : index
    %9 = memref.load %arg3[%c0_15] : memref<3xf32, #tpu.memory_space<smem>>
    %c1_16 = arith.constant 1 : index
    %10 = memref.load %arg3[%c1_16] : memref<3xf32, #tpu.memory_space<smem>>
    %c2_17 = arith.constant 2 : index
    %11 = memref.load %arg3[%c2_17] : memref<3xf32, #tpu.memory_space<smem>>
    %c0_18 = arith.constant 0 : index
    %c0_19 = arith.constant 0 : index
    %c0_20 = arith.constant 0 : index
    %c0_21 = arith.constant 0 : index
    %12 = vector.load %arg4[%c0_18, %c0_19, %c0_20, %c0_21] : memref<1x3x2x128xf32, #tpu.memory_space<vmem>>, vector<1x1x2x128xf32>
    %13 = vector.shape_cast %12 : vector<1x1x2x128xf32> to vector<2x128xf32>
    %14 = vector.broadcast %0 : f32 to vector<2x128xf32>
    %15 = arith.mulf %13, %14 : vector<2x128xf32>
    %c0_22 = arith.constant 0 : index
    %c1_23 = arith.constant 1 : index
    %c0_24 = arith.constant 0 : index
    %c0_25 = arith.constant 0 : index
    %16 = vector.load %arg4[%c0_22, %c1_23, %c0_24, %c0_25] : memref<1x3x2x128xf32, #tpu.memory_space<vmem>>, vector<1x1x2x128xf32>
    %17 = vector.shape_cast %16 : vector<1x1x2x128xf32> to vector<2x128xf32>
    %18 = vector.broadcast %1 : f32 to vector<2x128xf32>
    %19 = arith.mulf %17, %18 : vector<2x128xf32>
    %20 = arith.addf %15, %19 : vector<2x128xf32>
    %c0_26 = arith.constant 0 : index
    %c2_27 = arith.constant 2 : index
    %c0_28 = arith.constant 0 : index
    %c0_29 = arith.constant 0 : index
    %21 = vector.load %arg4[%c0_26, %c2_27, %c0_28, %c0_29] : memref<1x3x2x128xf32, #tpu.memory_space<vmem>>, vector<1x1x2x128xf32>
    %22 = vector.shape_cast %21 : vector<1x1x2x128xf32> to vector<2x128xf32>
    %23 = vector.broadcast %2 : f32 to vector<2x128xf32>
    %24 = arith.mulf %22, %23 : vector<2x128xf32>
    %25 = arith.addf %20, %24 : vector<2x128xf32>
    %26 = vector.broadcast %9 : f32 to vector<2x128xf32>
    %27 = arith.addf %25, %26 : vector<2x128xf32>
    %c0_30 = arith.constant 0 : index
    %c0_31 = arith.constant 0 : index
    %c0_32 = arith.constant 0 : index
    %c0_33 = arith.constant 0 : index
    %28 = vector.load %arg5[%c0_30, %c0_31, %c0_32, %c0_33] : memref<1x3x2x128xf32, #tpu.memory_space<vmem>>, vector<1x1x2x128xf32>
    %29 = vector.shape_cast %28 : vector<1x1x2x128xf32> to vector<2x128xf32>
    %30 = vector.shape_cast %27 : vector<2x128xf32> to vector<1x1x2x128xf32>
    tpu.vector_store %arg5[%c0_30, %c0_31, %c0_32, %c0_33], %30 {strides = array<i32>} : memref<1x3x2x128xf32, #tpu.memory_space<vmem>>, vector<1x1x2x128xf32>,
    %c0_34 = arith.constant 0 : index
    %c0_35 = arith.constant 0 : index
    %c0_36 = arith.constant 0 : index
    %c0_37 = arith.constant 0 : index
    %31 = vector.load %arg4[%c0_34, %c0_35, %c0_36, %c0_37] : memref<1x3x2x128xf32, #tpu.memory_space<vmem>>, vector<1x1x2x128xf32>
    %32 = vector.shape_cast %31 : vector<1x1x2x128xf32> to vector<2x128xf32>
    %33 = vector.broadcast %3 : f32 to vector<2x128xf32>
    %34 = arith.mulf %32, %33 : vector<2x128xf32>
    %c0_38 = arith.constant 0 : index
    %c1_39 = arith.constant 1 : index
    %c0_40 = arith.constant 0 : index
    %c0_41 = arith.constant 0 : index
    %35 = vector.load %arg4[%c0_38, %c1_39, %c0_40, %c0_41] : memref<1x3x2x128xf32, #tpu.memory_space<vmem>>, vector<1x1x2x128xf32>
    %36 = vector.shape_cast %35 : vector<1x1x2x128xf32> to vector<2x128xf32>
    %37 = vector.broadcast %4 : f32 to vector<2x128xf32>
    %38 = arith.mulf %36, %37 : vector<2x128xf32>
    %39 = arith.addf %34, %38 : vector<2x128xf32>
    %c0_42 = arith.constant 0 : index
    %c2_43 = arith.constant 2 : index
    %c0_44 = arith.constant 0 : index
    %c0_45 = arith.constant 0 : index
    %40 = vector.load %arg4[%c0_42, %c2_43, %c0_44, %c0_45] : memref<1x3x2x128xf32, #tpu.memory_space<vmem>>, vector<1x1x2x128xf32>
    %41 = vector.shape_cast %40 : vector<1x1x2x128xf32> to vector<2x128xf32>
    %42 = vector.broadcast %5 : f32 to vector<2x128xf32>
    %43 = arith.mulf %41, %42 : vector<2x128xf32>
    %44 = arith.addf %39, %43 : vector<2x128xf32>
    %45 = vector.broadcast %10 : f32 to vector<2x128xf32>
    %46 = arith.addf %44, %45 : vector<2x128xf32>
    %c0_46 = arith.constant 0 : index
    %c1_47 = arith.constant 1 : index
    %c0_48 = arith.constant 0 : index
    %c0_49 = arith.constant 0 : index
    %47 = vector.load %arg5[%c0_46, %c1_47, %c0_48, %c0_49] : memref<1x3x2x128xf32, #tpu.memory_space<vmem>>, vector<1x1x2x128xf32>
    %48 = vector.shape_cast %47 : vector<1x1x2x128xf32> to vector<2x128xf32>
    %49 = vector.shape_cast %46 : vector<2x128xf32> to vector<1x1x2x128xf32>
    tpu.vector_store %arg5[%c0_46, %c1_47, %c0_48, %c0_49], %49 {strides = array<i32>} : memref<1x3x2x128xf32, #tpu.memory_space<vmem>>, vector<1x1x2x128xf32>,
    %c0_50 = arith.constant 0 : index
    %c0_51 = arith.constant 0 : index
    %c0_52 = arith.constant 0 : index
    %c0_53 = arith.constant 0 : index
    %50 = vector.load %arg4[%c0_50, %c0_51, %c0_52, %c0_53] : memref<1x3x2x128xf32, #tpu.memory_space<vmem>>, vector<1x1x2x128xf32>
    %51 = vector.shape_cast %50 : vector<1x1x2x128xf32> to vector<2x128xf32>
    %52 = vector.broadcast %6 : f32 to vector<2x128xf32>
    %53 = arith.mulf %51, %52 : vector<2x128xf32>
    %c0_54 = arith.constant 0 : index
    %c1_55 = arith.constant 1 : index
    %c0_56 = arith.constant 0 : index
    %c0_57 = arith.constant 0 : index
    %54 = vector.load %arg4[%c0_54, %c1_55, %c0_56, %c0_57] : memref<1x3x2x128xf32, #tpu.memory_space<vmem>>, vector<1x1x2x128xf32>
    %55 = vector.shape_cast %54 : vector<1x1x2x128xf32> to vector<2x128xf32>
    %56 = vector.broadcast %7 : f32 to vector<2x128xf32>
    %57 = arith.mulf %55, %56 : vector<2x128xf32>
    %58 = arith.addf %53, %57 : vector<2x128xf32>
    %c0_58 = arith.constant 0 : index
    %c2_59 = arith.constant 2 : index
    %c0_60 = arith.constant 0 : index
    %c0_61 = arith.constant 0 : index
    %59 = vector.load %arg4[%c0_58, %c2_59, %c0_60, %c0_61] : memref<1x3x2x128xf32, #tpu.memory_space<vmem>>, vector<1x1x2x128xf32>
    %60 = vector.shape_cast %59 : vector<1x1x2x128xf32> to vector<2x128xf32>
    %61 = vector.broadcast %8 : f32 to vector<2x128xf32>
    %62 = arith.mulf %60, %61 : vector<2x128xf32>
    %63 = arith.addf %58, %62 : vector<2x128xf32>
    %64 = vector.broadcast %11 : f32 to vector<2x128xf32>
    %65 = arith.addf %63, %64 : vector<2x128xf32>
    %c0_62 = arith.constant 0 : index
    %c2_63 = arith.constant 2 : index
    %c0_64 = arith.constant 0 : index
    %c0_65 = arith.constant 0 : index
    %66 = vector.load %arg5[%c0_62, %c2_63, %c0_64, %c0_65] : memref<1x3x2x128xf32, #tpu.memory_space<vmem>>, vector<1x1x2x128xf32>
    %67 = vector.shape_cast %66 : vector<1x1x2x128xf32> to vector<2x128xf32>
    %68 = vector.shape_cast %65 : vector<2x128xf32> to vector<1x1x2x128xf32>
    tpu.vector_store %arg5[%c0_62, %c2_63, %c0_64, %c0_65], %68 {strides = array<i32>} : memref<1x3x2x128xf32, #tpu.memory_space<vmem>>, vector<1x1x2x128xf32>,
    return
  }
  func.func @transform_0(%arg0: i32, %arg1: i32) -> (i32, i32) {
    %c0_i32 = arith.constant 0 : i32
    %c0_i32_0 = arith.constant 0 : i32
    %c0_i32_1 = arith.constant 0 : i32
    return %c0_i32, %c0_i32_0 : i32, i32
  }
  func.func @transform_1(%arg0: i32, %arg1: i32) -> i32 {
    %c0_i32 = arith.constant 0 : i32
    %c0_i32_0 = arith.constant 0 : i32
    return %c0_i32 : i32
  }
  func.func @transform_2(%arg0: i32, %arg1: i32) -> (i32, i32, i32, i32) {
    %c0_i32 = arith.constant 0 : i32
    %c0_i32_0 = arith.constant 0 : i32
    %c0_i32_1 = arith.constant 0 : i32
    return %arg0, %c0_i32, %arg1, %c0_i32_0 : i32, i32, i32, i32
  }
  func.func @transform_3(%arg0: i32, %arg1: i32) -> (i32, i32, i32, i32) {
    %c0_i32 = arith.constant 0 : i32
    %c0_i32_0 = arith.constant 0 : i32
    %c0_i32_1 = arith.constant 0 : i32
    return %arg0, %c0_i32, %arg1, %c0_i32_0 : i32, i32, i32, i32
  }
}

</mosaic_0001>

<bundles_post_ra>
// kernel: tpu_custom_call.1
= control target key start
LH: loop header
LB: loop body
LE: loop exit
PB: predicated region body
PF: predicated region fallthrough
CT: control target
= control target key end

     0   :  { %s908_s0 = inlined_call_operand.hbm [shape: f32[3,3], index: 0, kind: input, shape index: {}]   ;;  %s909_s1 = inlined_call_operand.vmem [shape: f32[3], index: 1, kind: input, shape index: {}]   ;;  %s910_s2 = inlined_call_operand.hbm [shape: f32[2,3,2,128], index: 2, kind: input, shape index: {}]   ;;  %s911_s3 = inlined_call_operand.hbm [shape: f32[2,3,2,128], index: 3, kind: output, shape index: {}]  }
   0x1   :  { %913 = sst [smem:[#allocation14_spill]] %s908_s0 }
   0x2   :  { %8 = vsyncpa [#allocation5], 0 }
   0x3   :  { %9 = vsyncpa [#allocation6], 0 }
   0x4   :  { %10 = vsyncpa [#allocation3], 0 }
   0x5   :  { %12 = vsyncpa [#allocation3 + $0x1], 0 }
   0x6   :  { %13 = vsyncpa [#allocation4], 0 }
   0x7   :  { %15 = vsyncpa [#allocation4 + $0x1], 0  ;;  %s707_s12 = smov 0   ;;  %s709_s13 = smov 0  }
   0x8   :  { %s711_s14 = smov 0   ;;  %s713_s15 = smov 0  }
   0x9   :  { %s715_s16 = smov 0   ;;  %s717_s17 = smov 0  }
   0xa LB: > { %s413_s18 = sadd.s32 4294967295, %s677_s17   ;;  %s414_s19 = sadd.s32 4294967294, %s677_s17   ;;  %s677_s17 = sphi %s717_s17, %s21_s17   ;;  %s673_s16 = sphi %s715_s16, %s929_s16   ;;  %s669_s15 = sphi %s713_s15, %s928_s15   ;;  %s665_s14 = sphi %s711_s14, %s927_s14   ;;  %s661_s13 = sphi %s709_s13, %s926_s13   ;;  %s657_s12 = sphi %s707_s12, %s925_s12  }
   0xb   : > { %s84_s20 = sadd.s32 1, %s665_s14  ;;  %p91_p0 = scmp.ne.s32.totalorder %s665_s14, %s661_s13 }
   0xc   : > { %p92_p1 = scmp.eq.s32.totalorder %s677_s17, 0  ;;  %p97_p2 = scmp.ne.s32.totalorder %s661_s13, %s657_s12 }
   0xd   : > { %p745_p3 = scmp.eq.s32.totalorder %s413_s18, 0  ;;  %p123_p4 = scmp.eq.s32.totalorder %s413_s18, 1 }
   0xe   : > { %p93_p5 = por %p92_p1, %p91_p0  ;;  %p129_p6 = scmp.eq.s32.totalorder %s414_s19, 1 }
   0xf   : > { %p751_p7 = por %p745_p3, %p97_p2  ;;  %p755_p8 = por %p123_p4, %p91_p0 }
  0x10   : > { %p759_p9 = por %p129_p6, %p97_p2  ;;  %p415_p10 = scmp.ge.s32.totalorder %s677_s17, 1 }
  0x11   : > { %s916_s23 = scalar_select %p755_p8, 1, 0 }
  0x12   : > { %s917_s24 = scalar_select %p759_p9, 1, 0 }
  0x13   : > { %p136_p11 = scmp.lt.s32.totalorder %s677_s17, 3  ;;  %p477_p1 = scmp.lt.s32.totalorder %s677_s17, 2 }
  0x14   : > { %s158_s28 = sshll.u32 %s909_s1, 4  ;;  %s169_s4 = sand.u32 1, %s665_s14   ;;  %s159_s28 = int_to_ptr.vmem [resolvable:$true] %s158_s28 }
  0x15   : > { %p766_p13 = pnand %p415_p10, %p136_p11  ;;  %p776_p4 = pnand %p477_p1, %p93_p5 }
  0x16   : > { %s33_s5 = sadd.s32 1, %s673_s16  ;;  %s679_s6 = smov [#allocation2]  }
  0x17   : > { %p460_p0 = pneg %p766_p13  ;;  %s921_s0 = sld [smem:[#allocation14_spill]] }
  0x18   : > { %s546_s9 = scalar_lea.vmem %s159_s28, 16  ;;  %p554_p1 = scmp.lt.s32.totalorder %s159_s28, %s159_s28 }
  0x19   : > { %p782_p2 = pnand %p460_p0, %p745_p3  ;;  %p547_p5 = scmp.ne.s32.totalorder %s159_s28, %s546_s9 }
  0x1a   : > { %p555_p0 = scmp.lt.s32.totalorder %s546_s9, %s546_s9 }
  0x1b   : > { %p548_p6 = pneg %p782_p2 }
  0x1c   : > { %p556_p12 = por %p555_p0, %p554_p1 }
  0x1d   : > { %463 = dma.hbm_to_smem (!%p782_p2), %s921_s0, 64, %s679_s6, [#allocation5]  }
  0x1e   : > { %p549_p10 = pnand %p548_p6, %p547_p5 }
  0x20   : > { %p550_p11 = pneg %p549_p10 }
  0x22   : > { %p557_p9 = pnand %p556_p12, %p550_p11 }
  0x24   : > { %560 = shalt.err (!%p557_p9)
}
  0x25   : > { %s680_s10 = smov [#allocation7]   ;;  %p35_p8 = scmp.ge.s32.totalorder %s33_s5, 2 }
  0x26   : > { %466 = dma.vmem_to_smem (!%p782_p2), %s159_s28, 16, %s680_s10, [#allocation6]  }
  0x27   : > { %s444_s11 = smul.u32 6, %s169_s4  ;;  %s931_s5 = smov (%p35_p8, %s33_s5), 0 }
  0x28   : > { %s445_s18 = smul.u32 96, %s673_s16  ;;  %s79_s19 = ssub.s32 %s673_s16, %s931_s5 }
  0x29   : > { %s173_s26 = scalar_lea.vmem [#allocation8], %s444_s11  ;;  %p82_p12 = scmp.eq.s32.totalorder %s79_s19, 0 }
  0x2a   : > { %s181_s27 = sshll.u32 %s173_s26, 4  ;;  %s180_s30 = scalar_lea.hbm %s910_s2, %s445_s18  ;;  %s182_s27 = int_to_ptr.vmem [resolvable:$true] %s181_s27 }
  0x2b   : > { %s808_s8 = scalar_select %p82_p12, %s665_s14, %s84_s20  }
  0x2c   : > { %s170_s9 = scalar_lea.sflag [#allocation3], %s169_s4  ;;  %p563_p9 = pneg %p776_p4 }
  0x2d   : > { %s574_s28 = scalar_lea.vmem %s182_s27, 96  ;;  %s681_s10 = smov [#allocation8]  }
  0x2e   : > { %p575_p8 = scmp.ne.s32.totalorder %s182_s27, %s574_s28  ;;  %s579_s0 = sshll.u32 %s681_s10, 4  ;;  %s580_s0 = int_to_ptr.vmem [resolvable:$false] %s579_s0 }
  0x2f   : > { %s581_s11 = scalar_lea.vmem %s580_s0, 192  ;;  %p582_p6 = scmp.lt.s32.totalorder %s182_s27, %s580_s0 }
  0x30   : > { %p577_p2 = pnand %p575_p8, %p563_p9  ;;  %p583_p10 = scmp.lt.s32.totalorder %s581_s11, %s574_s28 }
  0x32   : > { %p578_p5 = pneg %p577_p2  ;;  %p584_p11 = por %p583_p10, %p582_p6 }
  0x34   : > { %p585_p1 = pnand %p584_p11, %p578_p5 }
  0x36   : > { %588 = shalt.err (!%p585_p1)
}
  0x37   : > { %s682_s18 = smov 32   ;;  %s683_s20 = smov 2  }
  0x38   : > { %470 = dma.hbm_to_vmem [thread:$0]  (!%p776_p4), %s180_s30, 96, %s182_s27, %s170_s9, %s682_s18, %s682_s18, %s683_s20  }
  0x39   : > { %193 = sbr.rel (%p766_p13) target bundleno = 110 (0x6e), region = 32 }
  0x3e   : > { %640 = dma.done.wait (%p745_p3), [#allocation5], 64  }
  0x3f   : > { %642 = vsyncadd (%p745_p3), [#allocation5], 4294967232 }
  0x40   : > { %644 = dma.done.wait (%p745_p3), [#allocation6], 16  }
  0x41   : > { %646 = vsyncadd (%p745_p3), [#allocation6], 4294967280  ;;  %s825_s0 = sand.u32 1, %s661_s13  }
  0x42   : > { %s446_s25 = smul.u32 6, %s825_s0  ;;  %s204_s29 = scalar_lea.sflag [#allocation3], %s825_s0 }
  0x44   : > { %s831_s4 = scalar_lea.vmem [#allocation8], %s446_s25 }
  0x45   : > { %648 = dma.done.wait (%p751_p7), %s204_s29, 96  }
  0x46   : > { %650 = vsyncadd (%p751_p7), %s204_s29, 4294967200 }
  0x47   : > { %212 = sfence }
  0x48   : > { %s231_s21 = sld [smem:[#allocation2]]  ;;  %v243_v0 = vld [vmem:[%s831_s4] sm:$0x3]  ;;  %v433_v1 = vld [vmem:[%s831_s4 + $0x2] sm:$0x3]  ;;  %s230_s18 = scalar_lea.vmem [#allocation9], %s446_s25 }
  0x49   : > { %s423_s19 = sld [smem:[#allocation2 + $0x1]]  ;;  %v434_v3 = vld [vmem:[%s831_s4 + $0x4] sm:$0x3]  ;;  %v259_v8 = vld [vmem:[%s831_s4] sm:$0x3]  ;;  %s304_s20 = sshll.u32 %s230_s18, 4  ;;  %s855_s20 = int_to_ptr.vmem [resolvable:$true] %s304_s20 }
  0x4a   : > { %s424_s26 = sld [smem:[#allocation2 + $0x2]]  ;;  %v435_v10 = vld [vmem:[%s831_s4 + $0x2] sm:$0x3]  ;;  %v436_v13 = vld [vmem:[%s831_s4 + $0x4] sm:$0x3]  ;;  %s447_s29 = smul.u32 96, %s669_s15 }
  0x4b   : > { %s837_s27 = sld [smem:[#allocation7]]  ;;  %v274_v20 = vld [vmem:[%s831_s4] sm:$0x3]  ;;  %v438_v22 = vld [vmem:[%s831_s4 + $0x2] sm:$0x3]  ;;  %p922_p7 = scmp.ne.s32.totalorder %s916_s23, 0 }
  0x4c   : > { %s425_s6 = sld [smem:[#allocation2 + $0x80]]  ;;  %v439_v26 = vld [vmem:[%s831_s4 + $0x4] sm:$0x3]  ;;  %s684_s15 = smov [#allocation9]  }
  0x4d   : > { %s426_s7 = sld [smem:[#allocation2 + $0x81]] }
  0x4e   : > { %v244_v2 = vstv %s231_s21  ;;  %s427_s22 = sld [smem:[#allocation2 + $0x82]]  ;;  %s860_s21 = scalar_lea.hbm %s911_s3, %s447_s29 }
  0x4f   : > { %v245_v4 = vmul.f32 %v244_v2, %v243_v0  ;;  %v248_v5 = vstv %s423_s19  ;;  %s842_s30 = sld [smem:[#allocation7 + $0x1]]  ;;  %s290_s19 = scalar_lea.sflag [#allocation4], %s825_s0 }
  0x50   : > { %v249_v6 = vmul.f32 %v433_v1, %v248_v5  ;;  %v253_v7 = vstv %s424_s26  ;;  %s428_s9 = sld [smem:[#allocation2 + $0x100]]  ;;  %s589_s26 = scalar_lea.vmem %s855_s20, 96 }
  0x51   : > { %v254_v9 = vmul.f32 %v434_v3, %v253_v7  ;;  %s429_s28 = sld [smem:[#allocation2 + $0x101]]  ;;  %v256_v14 = vstv %s837_s27  ;;  %p590_p3 = scmp.ne.s32.totalorder %s855_s20, %s589_s26 }
  0x52   : > { %v250_v11 = vadd.f32 %v249_v6, %v245_v4  ;;  %v260_v12 = vstv %s425_s6  ;;  %s430_s10 = sld [smem:[#allocation2 + $0x102]]  ;;  %s593_s27 = sshll.u32 %s684_s15, 4  ;;  %s594_s27 = int_to_ptr.vmem [resolvable:$false] %s593_s27 }
  0x53   : > { %v261_v15 = vmul.f32 %v260_v12, %v259_v8  ;;  %v263_v16 = vstv %s426_s7  ;;  %s432_s11 = sld [smem:[#allocation7 + $0x2]]  ;;  %p591_p13 = pnand %p590_p3, %p922_p7 }
  0x54   : > { %v255_v17 = vadd.f32 %v254_v9, %v250_v11  ;;  %v264_v18 = vmul.f32 %v435_v10, %v263_v16  ;;  %v267_v19 = vstv %s427_s22  ;;  %s595_s6 = scalar_lea.vmem %s594_s27, 192  ;;  %p596_p0 = scmp.lt.s32.totalorder %s855_s20, %s594_s27 }
  0x55   : > { %v268_v21 = vmul.f32 %v436_v13, %v267_v19  ;;  %v270_v27 = vstv %s842_s30  ;;  %p592_p4 = pneg %p591_p13  ;;  %p597_p12 = scmp.lt.s32.totalorder %s595_s6, %s589_s26 }
  0x56   : > { %v257_v23 = vadd.f32 %v256_v14, %v255_v17  ;;  %v265_v24 = vadd.f32 %v264_v18, %v261_v15  ;;  %v275_v25 = vstv %s428_s9 }
  0x57   : > { %v276_v28 = vmul.f32 %v275_v25, %v274_v20  ;;  %v278_v29 = vstv %s429_s28  ;;  %p598_p9 = por %p597_p12, %p596_p0 }
  0x58   : > { %258 = vst [vmem:[%s230_s18] sm:$0x3] %v257_v23  ;;  %v269_v30 = vadd.f32 %v268_v21, %v265_v24  ;;  %v279_v31 = vmul.f32 %v438_v22, %v278_v29  ;;  %v282_v32 = vstv %s430_s10 }
  0x59   : > { %v283_v33 = vmul.f32 %v439_v26, %v282_v32  ;;  %v285_v36 = vstv %s432_s11  ;;  %p599_p8 = pnand %p598_p9, %p592_p4 }
  0x5a   : > { %v271_v34 = vadd.f32 %v270_v27, %v269_v30  ;;  %v280_v35 = vadd.f32 %v279_v31, %v276_v28 }
  0x5c   : > { %437 = vst [vmem:[%s230_s18 + $0x2] sm:$0x3] %v271_v34  ;;  %v284_v37 = vadd.f32 %v283_v33, %v280_v35 }
  0x5e   : > { %v286_v38 = vadd.f32 %v285_v36, %v284_v37 }
  0x60   : > { %440 = vst [vmem:[%s230_s18 + $0x4] sm:$0x3] %v286_v38 }
  0x61   : > { %602 = shalt.err (!%p599_p8)
}
  0x62   : > { %s603_s7 = scalar_lea.hbm %s860_s21, 96  ;;  %s607_s9 = scalar_lea.hbm %s911_s3, 192 }
  0x63   : > { %p604_p2 = scmp.ne.s32.totalorder %s860_s21, %s603_s7  ;;  %p608_p10 = scmp.lt.s32.totalorder %s860_s21, %s911_s3 }
  0x64   : > { %p609_p11 = scmp.lt.s32.totalorder %s607_s9, %s603_s7 }
  0x65   : > { %p605_p5 = pnand %p604_p2, %p922_p7 }
  0x66   : > { %p610_p1 = por %p609_p11, %p608_p10 }
  0x67   : > { %p606_p6 = pneg %p605_p5 }
  0x69   : > { %p611_p3 = pnand %p610_p1, %p606_p6 }
  0x6b   : > { %614 = shalt.err (!%p611_p3)
}
  0x6c   : > { %s685_s11 = smov 32   ;;  %s686_s18 = smov 2  }
  0x6d   : > { %458 = dma.vmem_to_hbm [thread:$0]  (%p922_p7), %s855_s20, 96, %s860_s21, %s290_s19, %s685_s11, %s685_s11, %s686_s18  }
  0x6e PF: > { %s319_s29 = sand.u32 1, %s657_s12   ;;  %p923_p13 = scmp.ne.s32.totalorder %s917_s24, 0 }
  0x6f   : > { %p924_p4 = scmp.ge.s32.totalorder %s677_s17, 2  ;;  %s320_s25 = scalar_lea.sflag [#allocation4], %s319_s29 }
  0x71   : > { %p472_p0 = pnand %p924_p4, %p923_p13 }
  0x73   : > { %p473_p12 = pneg %p472_p0 }
  0x75   : > { %652 = dma.done.wait (%p473_p12), %s320_s25, 96  }
  0x76   : > { %654 = vsyncadd (%p473_p12), %s320_s25, 4294967200  ;;  %s21_s17 = sadd.s32 1, %s677_s17   ;;  %s925_s12 = smov %s661_s13 }
  0x77   : > { %p18_p9 = scmp.ge.s32.totalorder %s21_s17, 4   ;;  %s926_s13 = smov %s665_s14 }
  0x78   : > { %s927_s14 = smov %s808_s8  ;;  %s928_s15 = smov %s673_s16 }
  0x79   : > { %s929_s16 = smov %s931_s5  ;;  %20 = sbr.rel (!%p18_p9) target bundleno = 10 (0xa), region = 91 }
  0x7e   :  { %325 = vsyncpa [#allocation3], 1 }
  0x7f   :  { %327 = vsyncpa [#allocation3 + $0x1], 1 }
  0x80   :  { %328 = vsyncpa [#allocation4], 1 }
  0x81   :  { %330 = vsyncpa [#allocation4 + $0x1], 1 }
  0x82   :  { %331 = vsyncpa [#allocation5], 1 }
  0x83   :  { %333 = vsyncpa [#allocation5 + $0x1], 1 }
  0x84   :  { %334 = vsyncpa [#allocation6], 1 }
  0x85   :  { %336 = vsyncpa [#allocation6 + $0x1], 1 }

</bundles_post_ra>
